<compile_context>
chip_gen: v5e
topology: v5e:2x2
jax: 0.10.0
libtpu: 0.0.40
codegen_flags: <defaults>
</compile_context>

<pallas_src>
import functools

import numpy as np

import jax
import jax.numpy as jnp
from jax.experimental import pallas as pl
from jax.experimental.pallas import tpu as pltpu

# ------------------------- model hyper-params (small) -----------------------
BERT_DIM = 1024          # fixed by nn.Linear(1024, hidden) in the module
HIDDEN = 128             # config.hidden_size
NUM_FILTERS = 8          # config.cnn.num_filters
FILTER_SIZES = (2, 3, 4) # config.cnn.filter_sizes
NUM_LABELS = 10          # config.num_labels
BATCH = 2
SEQ = 16
LANES = 128              # lane-dense intermediate / output width


def _bert_cnn_kernel(x_ref, shot_w_ref, conv_w_ref, fc_w_ref, bias_ref, out_ref,
                     *, batch, seq, max_k, num_filters, filter_sizes):
    rows = batch * seq
    lanes = out_ref.shape[-1]

    # ---- shot_dim: [B*S, 1024](bf16) @ [1024, H](bf16) -> f32 accumulate ----
    x_bf = x_ref[...].astype(jnp.bfloat16)
    h = jnp.dot(x_bf, shot_w_ref[...], preferred_element_type=jnp.float32)
    h = h + bias_ref[0:1, :]                                   # [B*S, H], H == 128

    # ---- tap-stacked activations -------------------------------------------
    # Column block j holds h shifted so that row r sees h[r + j].  Wrapped /
    # cross-sequence rows are neutralized by the in-kernel validity mask
    # (taps j < k) and by zero rows of the packed conv weight (taps j >= k).
    taps = [h]
    for j in range(1, max_k):
        taps.append(jnp.roll(h, -j, axis=0))
    h_taps = jnp.concatenate(taps, axis=1).astype(jnp.bfloat16)  # [B*S, max_k*H] bf16

    # ---- all conv branches fused into ONE lane-dense matmul -----------------
    # [B*S, max_k*H](bf16) @ [max_k*H, 128](bf16) -> f32.  Columns >= nk*F are
    # zero weights (lane padding); column nk*F carries the fc-bias "ones lane".
    act = jnp.dot(h_taps, conv_w_ref[...], preferred_element_type=jnp.float32)
    act = jnp.maximum(act + bias_ref[1:2, :], 0.0)               # conv bias + ReLU

    # ---- in-kernel time-validity mask (replaces a DMA'd [B*S, 128] array) ---
    t = jax.lax.broadcasted_iota(jnp.int32, (rows, lanes), 0) % seq
    c = jax.lax.broadcasted_iota(jnp.int32, (rows, lanes), 1)
    neg = jnp.float32(-1e30)
    for ki, k in enumerate(filter_sizes):
        in_cols = (c >= ki * num_filters) & (c < (ki + 1) * num_filters)
        act = jnp.where(in_cols & (t > seq - k), neg, act)

    # ---- max_pool1d over time, per sequence (static 8-aligned segments) -----
    feats = []
    for b in range(batch):
        seg = act[b * seq:(b + 1) * seq, :]                      # [S, 128]
        feats.append(jnp.max(seg, axis=0, keepdims=True))        # [1, 128]
    feat = jnp.concatenate(feats, axis=0)                        # [B, 128]

    # ---- dropout: identity (eval).  fc_cnn; fc_b folded via the ones lane ---
    logits = jnp.dot(feat, fc_w_ref[...], preferred_element_type=jnp.float32)
    out_ref[...] = logits.astype(out_ref.dtype)


def pack_params(shot_w, shot_b, conv_ws, conv_bs, fc_w, fc_b):
    """One-time, host-side (numpy) packing of all constant weights.

    Returns (shot_w_bf16, conv_w_packed_bf16, fc_w_padded_f32, biases_f32)
    as device arrays ready to feed bert_cnn_forward on every call.
    """
    h_dim = shot_w.shape[1]
    nk, f = len(FILTER_SIZES), NUM_FILTERS
    max_k = max(FILTER_SIZES)
    assert h_dim == LANES, "packing assumes hidden_size == 128 lanes"
    assert nk * f < LANES, "need a spare lane for the fc-bias ones column"

    # shot_dim weight: bf16 once (MXU-native, halves its HBM bytes).
    shot_w_bf = jnp.asarray(np.asarray(shot_w, np.float32)).astype(jnp.bfloat16)

    # Packed conv weight [max_k*H, 128] (zero rows for taps a filter doesn't
    # use, zero columns past nk*F), cast to bf16 once.
    conv_w = np.zeros((max_k * h_dim, LANES), np.float32)
    for j in range(max_k):
        for ki, k in enumerate(FILTER_SIZES):
            if j < k:
                conv_w[j * h_dim:(j + 1) * h_dim, ki * f:(ki + 1) * f] = (
                    np.asarray(conv_ws[ki][j], np.float32))
    conv_w_bf = jnp.asarray(conv_w).astype(jnp.bfloat16)

    # Biases stacked into one [2, 128] f32 array:
    #   row 0 = shot_b, row 1 = conv_b (lane-padded) with column nk*F == 1.0
    #   (the "ones lane": ReLU(1.0) max-pools to 1.0 in feat column nk*F).
    biases = np.zeros((2, LANES), np.float32)
    biases[0, :h_dim] = np.asarray(shot_b, np.float32).reshape(-1)
    biases[1, :nk * f] = np.concatenate(
        [np.asarray(b, np.float32).reshape(-1) for b in conv_bs])
    biases[1, nk * f] = 1.0

    # fc weight padded to [128, 128]; row nk*F carries fc_b (picked up by the
    # ones lane), rows past that and columns past NUM_LABELS are zero.
    fc_w_pad = np.zeros((LANES, LANES), np.float32)
    fc_w_pad[:nk * f, :NUM_LABELS] = np.asarray(fc_w, np.float32)
    fc_w_pad[nk * f, :NUM_LABELS] = np.asarray(fc_b, np.float32).reshape(-1)

    return (shot_w_bf, conv_w_bf, jnp.asarray(fc_w_pad), jnp.asarray(biases))


def bert_cnn_forward(encoder_out, packed):
    """encoder_out: [B, S, BERT_DIM] f32; packed: result of pack_params().

    Returns logits [B, NUM_LABELS] f32.
    """
    shot_w_bf, conv_w_bf, fc_w_pad, biases = packed
    b, s, d = encoder_out.shape
    # -1e30 masking before the max-pool requires >= 1 valid row per filter.
    assert s >= max(FILTER_SIZES), "sequence shorter than largest filter"
    rows = b * s
    max_k = max(FILTER_SIZES)

    # Metadata-only reshape; the bf16 cast of the activations happens
    # in-kernel so the per-call wrapper does no elementwise XLA work.
    x2d = encoder_out.reshape(rows, d)

    kernel = functools.partial(
        _bert_cnn_kernel, batch=b, seq=s, max_k=max_k,
        num_filters=NUM_FILTERS, filter_sizes=FILTER_SIZES)

    def _full(arr):
        n = arr.ndim
        return pl.BlockSpec(arr.shape, lambda i, n=n: (0,) * n)

    inputs = (x2d, shot_w_bf, conv_w_bf, fc_w_pad, biases)

    out_pad = pl.pallas_call(
        kernel,
        out_shape=jax.ShapeDtypeStruct((b, LANES), jnp.float32),
        grid_spec=pltpu.PrefetchScalarGridSpec(
            num_scalar_prefetch=0,
            grid=(1,),                       # single step: batch folded into M
            in_specs=[_full(a) for a in inputs],
            out_specs=pl.BlockSpec((b, LANES), lambda i: (0, 0)),
        ),
        compiler_params=pltpu.CompilerParams(
            dimension_semantics=("arbitrary",)),
    )(*inputs)
    return out_pad[:, :NUM_LABELS]


def _reference(encoder_out, shot_w, shot_b, conv_ws, conv_bs, fc_w, fc_b):
    h = jnp.einsum("bsd,dh->bsh", encoder_out, shot_w) + shot_b   # [B,S,H]
    parts = []
    for wk, bk, k in zip(conv_ws, conv_bs, FILTER_SIZES):
        t_out = h.shape[1] - k + 1
        s = jnp.zeros((h.shape[0], t_out, NUM_FILTERS), jnp.float32)
        for j in range(k):
            s = s + jnp.einsum("bth,hf->btf", h[:, j:j + t_out, :], wk[j])
        s = jax.nn.relu(s + bk)
        parts.append(jnp.max(s, axis=1))                          # [B, F]
    feat = jnp.concatenate(parts, axis=1)
    return feat @ fc_w + fc_b


if __name__ == "__main__":
    key = jax.random.PRNGKey(0)
    keys = jax.random.split(key, 16)

    # Synthetic BERT encoder output (stands in for BertModel sequence output).
    encoder_out = jax.random.normal(keys[0], (BATCH, SEQ, BERT_DIM),
                                    jnp.float32) * 0.1

    # shot_dim: Linear(1024, HIDDEN)
    shot_w = jax.random.normal(keys[1], (BERT_DIM, HIDDEN), jnp.float32) * 0.02
    shot_b = jax.random.normal(keys[2], (1, HIDDEN), jnp.float32) * 0.02

    # convs: Conv2d(1, NUM_FILTERS, (k, HIDDEN)) -> weight stored as
    # [k, H, F]; bias [1, F].
    conv_ws, conv_bs = [], []
    for i, k in enumerate(FILTER_SIZES):
        conv_ws.append(jax.random.normal(keys[3 + i], (k, HIDDEN, NUM_FILTERS),
                                         jnp.float32) * 0.05)
        conv_bs.append(jax.random.normal(keys[8 + i], (1, NUM_FILTERS),
                                         jnp.float32) * 0.05)

    # fc_cnn: Linear(NUM_FILTERS * len(FILTER_SIZES), NUM_LABELS)
    fc_in = NUM_FILTERS * len(FILTER_SIZES)
    fc_w = jax.random.normal(keys[12], (fc_in, NUM_LABELS), jnp.float32) * 0.05
    fc_b = jax.random.normal(keys[13], (1, NUM_LABELS), jnp.float32) * 0.05

    # One-time packing (hoisted out of the per-call path).
    packed = pack_params(shot_w, shot_b, conv_ws, conv_bs, fc_w, fc_b)

    out = bert_cnn_forward(encoder_out, packed)
    out = jax.block_until_ready(out)

    ref = _reference(encoder_out, shot_w, shot_b, conv_ws, conv_bs, fc_w, fc_b)
    assert out.shape == (BATCH, NUM_LABELS)
    # bf16 operands in the shot_dim AND fused-conv matmuls (f32 accumulation)
    # -> slightly relaxed tolerance vs the pure-f32 reference.
    assert jnp.allclose(out, ref, atol=3e-3, rtol=3e-3), "mismatch vs reference"

    print("KERNEL_OK")
</pallas_src>

<mosaic_0001>
module attributes {stable_mosaic.version = 11 : i64} {
  func.func @_bert_cnn_kernel(%arg0: i32, %arg1: memref<32x1024xf32, #tpu.memory_space<vmem>>, %arg2: memref<1024x128xbf16, #tpu.memory_space<vmem>>, %arg3: memref<512x128xbf16, #tpu.memory_space<vmem>>, %arg4: memref<128x128xf32, #tpu.memory_space<vmem>>, %arg5: memref<2x128xf32, #tpu.memory_space<vmem>>, %arg6: memref<2x128xf32, #tpu.memory_space<vmem>>) attributes {dimension_semantics = [#tpu.dimension_semantics<arbitrary>], iteration_bounds = array<i64: 1>, scalar_prefetch = 0 : i64, scratch_operands = 0 : i64, tpu.core_type = #tpu.core_type<tc>, window_params = [{pipeline_mode = #tpu.pipeline_mode<synchronous>, transform_indices = @transform_0, window_bounds = array<i64: 32, 1024>}, {pipeline_mode = #tpu.pipeline_mode<synchronous>, transform_indices = @transform_1, window_bounds = array<i64: 1024, 128>}, {pipeline_mode = #tpu.pipeline_mode<synchronous>, transform_indices = @transform_2, window_bounds = array<i64: 512, 128>}, {pipeline_mode = #tpu.pipeline_mode<synchronous>, transform_indices = @transform_3, window_bounds = array<i64: 128, 128>}, {pipeline_mode = #tpu.pipeline_mode<synchronous>, transform_indices = @transform_4, window_bounds = array<i64: 2, 128>}, {pipeline_mode = #tpu.pipeline_mode<synchronous>, transform_indices = @transform_5, window_bounds = array<i64: 2, 128>}]} {
    %c0 = arith.constant 0 : index
    %c0_0 = arith.constant 0 : index
    %0 = vector.load %arg1[%c0, %c0_0] : memref<32x1024xf32, #tpu.memory_space<vmem>>, vector<32x1024xf32>
    %1 = arith.truncf %0 : vector<32x1024xf32> to vector<32x1024xbf16>
    %c0_1 = arith.constant 0 : index
    %c0_2 = arith.constant 0 : index
    %2 = vector.load %arg2[%c0_1, %c0_2] : memref<1024x128xbf16, #tpu.memory_space<vmem>>, vector<1024x128xbf16>
    %cst = arith.constant dense<0.000000e+00> : vector<32x128xf32>
    %3 = tpu.matmul %1, %2, %cst {dimension_numbers = #tpu.dot_dimension_numbers<[1], [0], [0], [1], [0, 0, 1, 1], [], []>} : vector<32x1024xbf16>, vector<1024x128xbf16>, vector<32x128xf32> -> vector<32x128xf32>
    %c0_3 = arith.constant 0 : index
    %c0_4 = arith.constant 0 : index
    %4 = vector.load %arg5[%c0_3, %c0_4] : memref<2x128xf32, #tpu.memory_space<vmem>>, vector<1x128xf32>
    %5 = vector.broadcast %4 : vector<1x128xf32> to vector<32x128xf32>
    %6 = arith.addf %3, %5 : vector<32x128xf32>
    %7 = vector.extract_strided_slice %6 {offsets = [1, 0], sizes = [31, 128], strides = [1, 1]} : vector<32x128xf32> to vector<31x128xf32>
    %8 = vector.extract_strided_slice %6 {offsets = [0, 0], sizes = [1, 128], strides = [1, 1]} : vector<32x128xf32> to vector<1x128xf32>
    %9 = tpu.concatenate %7, %8 in 0 : vector<31x128xf32>, vector<1x128xf32> -> vector<32x128xf32>
    %10 = vector.extract_strided_slice %6 {offsets = [2, 0], sizes = [30, 128], strides = [1, 1]} : vector<32x128xf32> to vector<30x128xf32>
    %11 = vector.extract_strided_slice %6 {offsets = [0, 0], sizes = [2, 128], strides = [1, 1]} : vector<32x128xf32> to vector<2x128xf32>
    %12 = tpu.concatenate %10, %11 in 0 : vector<30x128xf32>, vector<2x128xf32> -> vector<32x128xf32>
    %13 = vector.extract_strided_slice %6 {offsets = [3, 0], sizes = [29, 128], strides = [1, 1]} : vector<32x128xf32> to vector<29x128xf32>
    %14 = vector.extract_strided_slice %6 {offsets = [0, 0], sizes = [3, 128], strides = [1, 1]} : vector<32x128xf32> to vector<3x128xf32>
    %15 = tpu.concatenate %13, %14 in 0 : vector<29x128xf32>, vector<3x128xf32> -> vector<32x128xf32>
    %16 = tpu.concatenate %6, %9, %12, %15 in 1 : vector<32x128xf32>, vector<32x128xf32>, vector<32x128xf32>, vector<32x128xf32> -> vector<32x512xf32>
    %17 = arith.truncf %16 : vector<32x512xf32> to vector<32x512xbf16>
    %c0_5 = arith.constant 0 : index
    %c0_6 = arith.constant 0 : index
    %18 = vector.load %arg3[%c0_5, %c0_6] : memref<512x128xbf16, #tpu.memory_space<vmem>>, vector<512x128xbf16>
    %cst_7 = arith.constant dense<0.000000e+00> : vector<32x128xf32>
    %19 = tpu.matmul %17, %18, %cst_7 {dimension_numbers = #tpu.dot_dimension_numbers<[1], [0], [0], [1], [0, 0, 1, 1], [], []>} : vector<32x512xbf16>, vector<512x128xbf16>, vector<32x128xf32> -> vector<32x128xf32>
    %c1 = arith.constant 1 : index
    %c0_8 = arith.constant 0 : index
    %20 = vector.load %arg5[%c1, %c0_8] : memref<2x128xf32, #tpu.memory_space<vmem>>, vector<1x128xf32>
    %21 = vector.broadcast %20 : vector<1x128xf32> to vector<32x128xf32>
    %22 = arith.addf %19, %21 : vector<32x128xf32>
    %cst_9 = arith.constant 0.000000e+00 : f32
    %23 = vector.broadcast %cst_9 : f32 to vector<32x128xf32>
    %24 = arith.maximumf %22, %23 : vector<32x128xf32>
    %25 = tpu.iota {dimensions = array<i32: 0>} : vector<32x128xi32>
    %c16_i32 = arith.constant 16 : i32
    %c0_i32 = arith.constant 0 : i32
    %26 = arith.cmpi eq, %c16_i32, %c0_i32 : i32
    %c1_i32 = arith.constant 1 : i32
    %27 = arith.select %26, %c1_i32, %c16_i32 : i32
    %28 = vector.broadcast %27 : i32 to vector<32x128xi32>
    %29 = arith.remsi %25, %28 : vector<32x128xi32>
    %c0_i32_10 = arith.constant 0 : i32
    %30 = vector.broadcast %c0_i32_10 : i32 to vector<32x128xi32>
    %31 = arith.cmpi ne, %29, %30 : vector<32x128xi32>
    %c0_i32_11 = arith.constant 0 : i32
    %32 = vector.broadcast %c0_i32_11 : i32 to vector<32x128xi32>
    %33 = arith.cmpi slt, %29, %32 : vector<32x128xi32>
    %c0_i32_12 = arith.constant 0 : i32
    %34 = arith.cmpi slt, %27, %c0_i32_12 : i32
    %35 = vector.broadcast %34 : i1 to vector<32x128xi1>
    %36 = vector.broadcast %35 : vector<32x128xi1> to vector<32x128xi1>
    %37 = arith.xori %33, %36 : vector<32x128xi1>
    %38 = arith.andi %37, %31 : vector<32x128xi1>
    %39 = vector.broadcast %27 : i32 to vector<32x128xi32>
    %40 = arith.addi %29, %39 : vector<32x128xi32>
    %41 = arith.select %38, %40, %29 : vector<32x128xi1>, vector<32x128xi32>
    %42 = tpu.iota {dimensions = array<i32: 1>} : vector<32x128xi32>
    %c0_i32_13 = arith.constant 0 : i32
    %43 = vector.broadcast %c0_i32_13 : i32 to vector<32x128xi32>
    %44 = arith.cmpi sge, %42, %43 : vector<32x128xi32>
    %c8_i32 = arith.constant 8 : i32
    %45 = vector.broadcast %c8_i32 : i32 to vector<32x128xi32>
    %46 = arith.cmpi slt, %42, %45 : vector<32x128xi32>
    %47 = arith.andi %44, %46 : vector<32x128xi1>
    %c14_i32 = arith.constant 14 : i32
    %48 = vector.broadcast %c14_i32 : i32 to vector<32x128xi32>
    %49 = arith.cmpi sgt, %41, %48 : vector<32x128xi32>
    %50 = arith.andi %47, %49 : vector<32x128xi1>
    %cst_14 = arith.constant -1.000000e+30 : f32
    %51 = vector.broadcast %cst_14 : f32 to vector<32x128xf32>
    %52 = arith.select %50, %51, %24 : vector<32x128xi1>, vector<32x128xf32>
    %c8_i32_15 = arith.constant 8 : i32
    %53 = vector.broadcast %c8_i32_15 : i32 to vector<32x128xi32>
    %54 = arith.cmpi sge, %42, %53 : vector<32x128xi32>
    %c16_i32_16 = arith.constant 16 : i32
    %55 = vector.broadcast %c16_i32_16 : i32 to vector<32x128xi32>
    %56 = arith.cmpi slt, %42, %55 : vector<32x128xi32>
    %57 = arith.andi %54, %56 : vector<32x128xi1>
    %c13_i32 = arith.constant 13 : i32
    %58 = vector.broadcast %c13_i32 : i32 to vector<32x128xi32>
    %59 = arith.cmpi sgt, %41, %58 : vector<32x128xi32>
    %60 = arith.andi %57, %59 : vector<32x128xi1>
    %cst_17 = arith.constant -1.000000e+30 : f32
    %61 = vector.broadcast %cst_17 : f32 to vector<32x128xf32>
    %62 = arith.select %60, %61, %52 : vector<32x128xi1>, vector<32x128xf32>
    %c16_i32_18 = arith.constant 16 : i32
    %63 = vector.broadcast %c16_i32_18 : i32 to vector<32x128xi32>
    %64 = arith.cmpi sge, %42, %63 : vector<32x128xi32>
    %c24_i32 = arith.constant 24 : i32
    %65 = vector.broadcast %c24_i32 : i32 to vector<32x128xi32>
    %66 = arith.cmpi slt, %42, %65 : vector<32x128xi32>
    %67 = arith.andi %64, %66 : vector<32x128xi1>
    %c12_i32 = arith.constant 12 : i32
    %68 = vector.broadcast %c12_i32 : i32 to vector<32x128xi32>
    %69 = arith.cmpi sgt, %41, %68 : vector<32x128xi32>
    %70 = arith.andi %67, %69 : vector<32x128xi1>
    %cst_19 = arith.constant -1.000000e+30 : f32
    %71 = vector.broadcast %cst_19 : f32 to vector<32x128xf32>
    %72 = arith.select %70, %71, %62 : vector<32x128xi1>, vector<32x128xf32>
    %73 = vector.extract_strided_slice %72 {offsets = [0, 0], sizes = [16, 128], strides = [1, 1]} : vector<32x128xf32> to vector<16x128xf32>
    %cst_20 = arith.constant dense<0xFF800000> : vector<128xf32>
    %74 = vector.multi_reduction <maximumf>, %73, %cst_20 [0] : vector<16x128xf32> to vector<128xf32>
    %75 = vector.shape_cast %74 : vector<128xf32> to vector<1x128xf32>
    %76 = vector.extract_strided_slice %72 {offsets = [16, 0], sizes = [16, 128], strides = [1, 1]} : vector<32x128xf32> to vector<16x128xf32>
    %cst_21 = arith.constant dense<0xFF800000> : vector<128xf32>
    %77 = vector.multi_reduction <maximumf>, %76, %cst_21 [0] : vector<16x128xf32> to vector<128xf32>
    %78 = vector.shape_cast %77 : vector<128xf32> to vector<1x128xf32>
    %79 = tpu.concatenate %75, %78 in 0 : vector<1x128xf32>, vector<1x128xf32> -> vector<2x128xf32>
    %c0_22 = arith.constant 0 : index
    %c0_23 = arith.constant 0 : index
    %80 = vector.load %arg4[%c0_22, %c0_23] : memref<128x128xf32, #tpu.memory_space<vmem>>, vector<128x128xf32>
    %cst_24 = arith.constant dense<0.000000e+00> : vector<2x128xf32>
    %81 = tpu.matmul %79, %80, %cst_24 {dimension_numbers = #tpu.dot_dimension_numbers<[1], [0], [0], [1], [0, 0, 1, 1], [], []>} : vector<2x128xf32>, vector<128x128xf32>, vector<2x128xf32> -> vector<2x128xf32>
    %c0_25 = arith.constant 0 : index
    %c0_26 = arith.constant 0 : index
    %82 = vector.load %arg6[%c0_25, %c0_26] : memref<2x128xf32, #tpu.memory_space<vmem>>, vector<2x128xf32>
    tpu.vector_store %arg6[%c0_25, %c0_26], %81 {strides = array<i32>} : memref<2x128xf32, #tpu.memory_space<vmem>>, vector<2x128xf32>,
    return
  }
  func.func @transform_0(%arg0: i32) -> (i32, i32) {
    %c0_i32 = arith.constant 0 : i32
    %c0_i32_0 = arith.constant 0 : i32
    %c0_i32_1 = arith.constant 0 : i32
    return %c0_i32, %c0_i32_0 : i32, i32
  }
  func.func @transform_1(%arg0: i32) -> (i32, i32) {
    %c0_i32 = arith.constant 0 : i32
    %c0_i32_0 = arith.constant 0 : i32
    %c0_i32_1 = arith.constant 0 : i32
    return %c0_i32, %c0_i32_0 : i32, i32
  }
  func.func @transform_2(%arg0: i32) -> (i32, i32) {
    %c0_i32 = arith.constant 0 : i32
    %c0_i32_0 = arith.constant 0 : i32
    %c0_i32_1 = arith.constant 0 : i32
    return %c0_i32, %c0_i32_0 : i32, i32
  }
  func.func @transform_3(%arg0: i32) -> (i32, i32) {
    %c0_i32 = arith.constant 0 : i32
    %c0_i32_0 = arith.constant 0 : i32
    %c0_i32_1 = arith.constant 0 : i32
    return %c0_i32, %c0_i32_0 : i32, i32
  }
  func.func @transform_4(%arg0: i32) -> (i32, i32) {
    %c0_i32 = arith.constant 0 : i32
    %c0_i32_0 = arith.constant 0 : i32
    %c0_i32_1 = arith.constant 0 : i32
    return %c0_i32, %c0_i32_0 : i32, i32
  }
  func.func @transform_5(%arg0: i32) -> (i32, i32) {
    %c0_i32 = arith.constant 0 : i32
    %c0_i32_0 = arith.constant 0 : i32
    %c0_i32_1 = arith.constant 0 : i32
    return %c0_i32, %c0_i32_0 : i32, i32
  }
}

</mosaic_0001>

<bundles_post_ra>
// kernel: tpu_custom_call.1
= control target key start
LH: loop header
LB: loop body
LE: loop exit
PB: predicated region body
PF: predicated region fallthrough
CT: control target
= control target key end

     0   :  { %10 = vsyncpa [#allocation3], 0  ;;  %s2100_s0 = inlined_call_operand.hbm [shape: f32[32,1024], index: 0, kind: input, shape index: {}]   ;;  %s2101_s1 = inlined_call_operand.hbm [shape: bf16[1024,128], index: 1, kind: input, shape index: {}]   ;;  %s2102_s2 = inlined_call_operand.hbm [shape: bf16[512,128], index: 2, kind: input, shape index: {}]   ;;  %s2103_s3 = inlined_call_operand.hbm [shape: f32[128,128], index: 3, kind: input, shape index: {}]   ;;  %s2104_s4 = inlined_call_operand.vmem [shape: f32[2,128], index: 4, kind: input, shape index: {}]   ;;  %s2105_s5 = inlined_call_operand.hbm [shape: f32[2,128], index: 5, kind: output, shape index: {}]  }
   0x1   :  { %11 = vsyncpa [#allocation6], 0 }
   0x2   :  { %12 = vsyncpa [#allocation9], 0  ;;  %s31_s20 = sshll.u32 %s2101_s1, 4  ;;  %s32_s20 = int_to_ptr.hbm [resolvable:$true] %s31_s20 }
   0x3   :  { %13 = vsyncpa [#allocation4], 0  ;;  %s1982_s21 = smov [#allocation5]   ;;  %s18_s25 = sshll.u32 %s2100_s0, 4  ;;  %s19_s25 = int_to_ptr.hbm [resolvable:$true] %s18_s25 }
   0x4   :  { %s33_s22 = sshll.u32 %s1982_s21, 4  ;;  %s1983_s26 = smov 64   ;;  %s34_s22 = int_to_ptr.vmem [resolvable:$true] %s33_s22 }
   0x5   :  { %s1984_s27 = smov 4   ;;  %s1985_s28 = smov [#allocation2]  }
   0x6   :  { %39 = dma.hbm_to_vmem [thread:$0]  %s32_s20, 8192, %s34_s22, [#allocation6], %s1983_s26, %s1983_s26, %s1984_s27  }
   0x7   :  { %s20_s29 = sshll.u32 %s1985_s28, 4  ;;  %s44_s1 = sshll.u32 %s2102_s2, 4  ;;  %s21_s29 = int_to_ptr.vmem [resolvable:$true] %s20_s29  ;;  %s45_s1 = int_to_ptr.hbm [resolvable:$true] %s44_s1 }
   0x8   :  { %s1986_s7 = smov 1024   ;;  %s1987_s8 = smov [#allocation7]  }
   0x9   :  { %26 = dma.hbm_to_vmem [thread:$0]  %s19_s25, 4096, %s21_s29, [#allocation3], %s1986_s7, %s1986_s7, %s1983_s26  }
   0xa   :  { %s46_s9 = sshll.u32 %s1987_s8, 4  ;;  %s57_s0 = sshll.u32 %s2103_s3, 4  ;;  %s47_s9 = int_to_ptr.vmem [resolvable:$true] %s46_s9  ;;  %s58_s0 = int_to_ptr.hbm [resolvable:$true] %s57_s0 }
   0xb   :  { %52 = dma.hbm_to_vmem [thread:$0]  %s45_s1, 4096, %s47_s9, [#allocation6], %s1983_s26, %s1983_s26, %s1984_s27  }
   0xc   :  { %s1988_s12 = smov [#allocation8]   ;;  %s1989_s14 = smov 128  }
   0xd   :  { %s59_s13 = sshll.u32 %s1988_s12, 4  ;;  %s1990_s15 = smov 8   ;;  %s60_s13 = int_to_ptr.vmem [resolvable:$true] %s59_s13 }
   0xe   :  { %65 = dma.hbm_to_vmem [thread:$0]  %s58_s0, 2048, %s60_s13, [#allocation9], %s1989_s14, %s1989_s14, %s1990_s15  }
   0xf   :  { %1974 = dma.done.wait [#allocation3], 4096  }
  0x10   :  { %1975 = vsyncadd [#allocation3], 4294963200 }
  0x11   :  { %1976 = dma.done.wait [#allocation6], 12288  }
  0x12   :  { %1977 = vsyncadd [#allocation6], 4294955008 }
  0x13   :  { %1978 = dma.done.wait [#allocation9], 2048  }
  0x14   :  { %1979 = vsyncadd [#allocation9], 4294965248  ;;  %v1753_v0 = vld [vmem:[#allocation5 + $0x38] sm:$0xff]  ;;  %v1752_v4 = vld [vmem:[#allocation5 + $0x30] sm:$0xff]  ;;  %vm802_vm0 = vcmask 1046528   ;;  %vm816_vm1 = vcmask 1045504  }
  0x15   :  { %v1761_v1 = vld [vmem:[#allocation5 + $0x78] sm:$0xff]  ;;  %646 = vmatpush.bf16.msra.mxu0 %v1753_v0  ;;  %v1760_v5 = vld [vmem:[#allocation5 + $0x70] sm:$0xff]  ;;  %v1751_v8 = vld [vmem:[#allocation5 + $0x28] sm:$0xff]  ;;  %vm830_vm2 = vcmask 1044480   ;;  %s1350_s21 = sshll.u32 %s2105_s5, 4  ;;  %s1351_s21 = int_to_ptr.hbm [resolvable:$true] %s1350_s21 }
  0x16   :  { %v1769_v2 = vld [vmem:[#allocation5 + $0xb8] sm:$0xff]  ;;  %665 = vmatpush.bf16.msra.mxu1 %v1761_v1  ;;  %v1768_v6 = vld [vmem:[#allocation5 + $0xb0] sm:$0xff]  ;;  %v1759_v9 = vld [vmem:[#allocation5 + $0x68] sm:$0xff] }
  0x17   :  { %v1777_v3 = vld [vmem:[#allocation5 + $0xf8] sm:$0xff]  ;;  %684 = vmatpush.bf16.msra.mxu2 %v1769_v2  ;;  %v1776_v7 = vld [vmem:[#allocation5 + $0xf0] sm:$0xff]  ;;  %v1767_v10 = vld [vmem:[#allocation5 + $0xa8] sm:$0xff] }
  0x18   :  { %703 = vmatpush.bf16.msra.mxu3 %v1777_v3  ;;  %v1775_v11 = vld [vmem:[#allocation5 + $0xe8] sm:$0xff]  ;;  %v1750_v12 = vld [vmem:[#allocation5 + $0x20] sm:$0xff]  ;;  %v1749_v16 = vld [vmem:[#allocation5 + $0x18] sm:$0xff] }
  0x19   :  { %647 = vmatpush.bf16.msra.mxu0 %v1752_v4  ;;  %v1758_v13 = vld [vmem:[#allocation5 + $0x60] sm:$0xff]  ;;  %v1757_v17 = vld [vmem:[#allocation5 + $0x58] sm:$0xff]  ;;  %v1748_v20 = vld [vmem:[#allocation5 + $0x10] sm:$0xff] }
  0x1a   :  { %666 = vmatpush.bf16.msra.mxu1 %v1760_v5  ;;  %v1766_v14 = vld [vmem:[#allocation5 + $0xa0] sm:$0xff]  ;;  %v1765_v18 = vld [vmem:[#allocation5 + $0x98] sm:$0xff]  ;;  %v1756_v21 = vld [vmem:[#allocation5 + $0x50] sm:$0xff] }
  0x1b   :  { %685 = vmatpush.bf16.msra.mxu2 %v1768_v6  ;;  %v1774_v15 = vld [vmem:[#allocation5 + $0xe0] sm:$0xff]  ;;  %v1773_v19 = vld [vmem:[#allocation5 + $0xd8] sm:$0xff]  ;;  %v1764_v22 = vld [vmem:[#allocation5 + $0x90] sm:$0xff] }
  0x1c   :  { %704 = vmatpush.bf16.msra.mxu3 %v1776_v7  ;;  %v1772_v23 = vld [vmem:[#allocation5 + $0xd0] sm:$0xff]  ;;  %v1747_v24 = vld [vmem:[#allocation5 + $0x8] sm:$0xff]  ;;  %v1746_v28 = vld [vmem:[#allocation5] sm:$0xff] }
  0x1d   :  { %648 = vmatpush.bf16.msra.mxu0 %v1751_v8  ;;  %v1755_v25 = vld [vmem:[#allocation5 + $0x48] sm:$0xff]  ;;  %v1754_v29 = vld [vmem:[#allocation5 + $0x40] sm:$0xff]  ;;  %v86_v36 = vld [vmem:[#allocation2 + $0x10] sm:$0xff] }
  0x1e   :  { %667 = vmatpush.bf16.msra.mxu1 %v1759_v9  ;;  %v1763_v26 = vld [vmem:[#allocation5 + $0x88] sm:$0xff]  ;;  %v84_v30 = vld [vmem:[#allocation2] sm:$0xff]  ;;  %v94_v37 = vld [vmem:[#allocation2 + $0x50] sm:$0xff] }
  0x1f   :  { %686 = vmatpush.bf16.msra.mxu2 %v1767_v10  ;;  %v1771_v27 = vld [vmem:[#allocation5 + $0xc8] sm:$0xff]  ;;  %v1762_v31 = vld [vmem:[#allocation5 + $0x80] sm:$0xff]  ;;  %v87_v38 = vld [vmem:[#allocation2 + $0x18] sm:$0xff]  ;;  %v118_v44 = vpack.c.bf16 %v94_v37, %v86_v36 }
  0x20   :  { %705 = vmatpush.bf16.msra.mxu3 %v1775_v11  ;;  %v1770_v32 = vld [vmem:[#allocation5 + $0xc0] sm:$0xff]  ;;  %v85_v34 = vld [vmem:[#allocation2 + $0x8] sm:$0xff]  ;;  %v95_v39 = vld [vmem:[#allocation2 + $0x58] sm:$0xff] }
  0x21   :  { %649 = vmatpush.bf16.msra.mxu0 %v1750_v12  ;;  %v92_v33 = vld [vmem:[#allocation2 + $0x40] sm:$0xff]  ;;  %v93_v35 = vld [vmem:[#allocation2 + $0x48] sm:$0xff]  ;;  %v1801_v40 = vld [vmem:[#allocation5 + $0x1b8] sm:$0xff]  ;;  %v119_v45 = vpack.c.bf16 %v95_v39, %v87_v38 }
  0x22   :  { %668 = vmatpush.bf16.msra.mxu1 %v1758_v13  ;;  %v1785_v41 = vld [vmem:[#allocation5 + $0x138] sm:$0xff]  ;;  %v116_v42 = vpack.c.bf16 %v92_v33, %v84_v30  ;;  %v117_v43 = vpack.c.bf16 %v93_v35, %v85_v34  ;;  %v1800_v48 = vld [vmem:[#allocation5 + $0x1b0] sm:$0xff]  ;;  %v1799_v52 = vld [vmem:[#allocation5 + $0x1a8] sm:$0xff] }
  0x23   :  { %687 = vmatpush.bf16.msra.mxu2 %v1766_v14  ;;  %v1793_v46 = vld [vmem:[#allocation5 + $0x178] sm:$0xff]  ;;  %v1784_v49 = vld [vmem:[#allocation5 + $0x130] sm:$0xff]  ;;  %v1783_v53 = vld [vmem:[#allocation5 + $0x128] sm:$0xff] }
  0x24   :  { %706 = vmatpush.bf16.msra.mxu3 %v1774_v15  ;;  %v1809_v47 = vld [vmem:[#allocation5 + $0x1f8] sm:$0xff]  ;;  %v1792_v50 = vld [vmem:[#allocation5 + $0x170] sm:$0xff]  ;;  %v1791_v54 = vld [vmem:[#allocation5 + $0x168] sm:$0xff] }
  0x25   :  { %650 = vmatpush.bf16.msra.mxu0 %v1749_v16  ;;  %v1808_v51 = vld [vmem:[#allocation5 + $0x1f0] sm:$0xff]  ;;  %v1807_v55 = vld [vmem:[#allocation5 + $0x1e8] sm:$0xff]  ;;  %v1798_v56 = vld [vmem:[#allocation5 + $0x1a0] sm:$0xff] }
  0x26   :  { %669 = vmatpush.bf16.msra.mxu1 %v1757_v17  ;;  %v1782_v57 = vld [vmem:[#allocation5 + $0x120] sm:$0xff]  ;;  %v101_v62 = vld [vmem:[#allocation2 + $0x88] sm:$0xff]  ;;  %v102_v0 = vld [vmem:[#allocation2 + $0x90] sm:$0xff] }
  0x27   :  { %688 = vmatpush.bf16.msra.mxu2 %v1765_v18  ;;  %v1790_v58 = vld [vmem:[#allocation5 + $0x160] sm:$0xff]  ;;  %v109_v63 = vld [vmem:[#allocation2 + $0xc8] sm:$0xff]  ;;  %v110_v1 = vld [vmem:[#allocation2 + $0xd0] sm:$0xff] }
  0x28   :  { %707 = vmatpush.bf16.msra.mxu3 %v1773_v19  ;;  %v1806_v59 = vld [vmem:[#allocation5 + $0x1e0] sm:$0xff]  ;;  %v103_v2 = vld [vmem:[#allocation2 + $0x98] sm:$0xff]  ;;  %v125_v7 = vpack.c.bf16 %v109_v63, %v101_v62  ;;  %v126_v8 = vpack.c.bf16 %v110_v1, %v102_v0  ;;  %v1796_v12 = vld [vmem:[#allocation5 + $0x190] sm:$0xff] }
  0x29   :  { %651 = vmatpush.bf16.msra.mxu0 %v1748_v20  ;;  %v100_v60 = vld [vmem:[#allocation2 + $0x80] sm:$0xff]  ;;  %v111_v3 = vld [vmem:[#allocation2 + $0xd8] sm:$0xff]  ;;  %v1780_v13 = vld [vmem:[#allocation5 + $0x110] sm:$0xff] }
  0x2a   :  { %670 = vmatpush.bf16.msra.mxu1 %v1756_v21  ;;  %v108_v61 = vld [vmem:[#allocation2 + $0xc0] sm:$0xff]  ;;  %v1797_v4 = vld [vmem:[#allocation5 + $0x198] sm:$0xff]  ;;  %v127_v9 = vpack.c.bf16 %v111_v3, %v103_v2  ;;  %v1788_v14 = vld [vmem:[#allocation5 + $0x150] sm:$0xff] }
  0x2b   :  { %689 = vmatpush.bf16.msra.mxu2 %v1764_v22  ;;  %v1781_v5 = vld [vmem:[#allocation5 + $0x118] sm:$0xff]  ;;  %v124_v6 = vpack.c.bf16 %v108_v61, %v100_v60  ;;  %v1804_v15 = vld [vmem:[#allocation5 + $0x1d0] sm:$0xff]  ;;  %v1795_v16 = vld [vmem:[#allocation5 + $0x188] sm:$0xff] }
  0x2c   :  { %708 = vmatpush.bf16.msra.mxu3 %v1772_v23  ;;  %v1789_v10 = vld [vmem:[#allocation5 + $0x158] sm:$0xff]  ;;  %v1779_v17 = vld [vmem:[#allocation5 + $0x108] sm:$0xff]  ;;  %v1794_v20 = vld [vmem:[#allocation5 + $0x180] sm:$0xff] }
  0x2d   :  { %652 = vmatpush.bf16.msra.mxu0 %v1747_v24  ;;  %v1805_v11 = vld [vmem:[#allocation5 + $0x1d8] sm:$0xff]  ;;  %v1787_v18 = vld [vmem:[#allocation5 + $0x148] sm:$0xff]  ;;  %v1778_v21 = vld [vmem:[#allocation5 + $0x100] sm:$0xff] }
  0x2e   :  { %671 = vmatpush.bf16.msra.mxu1 %v1755_v25  ;;  %v1803_v19 = vld [vmem:[#allocation5 + $0x1c8] sm:$0xff]  ;;  %v1786_v22 = vld [vmem:[#allocation5 + $0x140] sm:$0xff]  ;;  %v91_v30 = vld [vmem:[#allocation2 + $0x38] sm:$0xff] }
  0x2f   :  { %690 = vmatpush.bf16.msra.mxu2 %v1763_v26  ;;  %v1802_v23 = vld [vmem:[#allocation5 + $0x1c0] sm:$0xff]  ;;  %v89_v26 = vld [vmem:[#allocation2 + $0x28] sm:$0xff]  ;;  %v1813_v60 = vld [vmem:[#allocation7 + $0x18] sm:$0xff] }
  0x30   :  { %709 = vmatpush.bf16.msra.mxu3 %v1771_v27  ;;  %v88_v24 = vld [vmem:[#allocation2 + $0x20] sm:$0xff]  ;;  %v97_v27 = vld [vmem:[#allocation2 + $0x68] sm:$0xff] }
  0x31   :  { %653 = vmatpush.bf16.msra.mxu0 %v1746_v28  ;;  %v96_v25 = vld [vmem:[#allocation2 + $0x60] sm:$0xff]  ;;  %v90_v28 = vld [vmem:[#allocation2 + $0x30] sm:$0xff]  ;;  %v121_v33 = vpack.c.bf16 %v97_v27, %v89_v26  ;;  %v105_v38 = vld [vmem:[#allocation2 + $0xa8] sm:$0xff] }
  0x32   :  { %672 = vmatpush.bf16.msra.mxu1 %v1754_v29  ;;  %v98_v29 = vld [vmem:[#allocation2 + $0x70] sm:$0xff]  ;;  %v104_v36 = vld [vmem:[#allocation2 + $0xa0] sm:$0xff]  ;;  %v113_v39 = vld [vmem:[#allocation2 + $0xe8] sm:$0xff] }
  0x33   :  { %691 = vmatpush.bf16.msra.mxu2 %v1762_v31  ;;  %v99_v31 = vld [vmem:[#allocation2 + $0x78] sm:$0xff]  ;;  %v122_v34 = vpack.c.bf16 %v98_v29, %v90_v28  ;;  %v112_v37 = vld [vmem:[#allocation2 + $0xe0] sm:$0xff]  ;;  %v1831_v1 = vld [vmem:[#allocation7 + $0xa8] sm:$0xff] }
  0x34   :  { %710 = vmatpush.bf16.msra.mxu3 %v1770_v32  ;;  %654 = vmatmul.bf16.vlgmr.msra.gmra.mxu0 %v116_v42  ;;  %v120_v32 = vpack.c.bf16 %v96_v25, %v88_v24  ;;  %v123_v35 = vpack.c.bf16 %v99_v31, %v91_v30  ;;  %v107_v42 = vld [vmem:[#allocation2 + $0xb8] sm:$0xff]  ;;  %v1823_v2 = vld [vmem:[#allocation7 + $0x68] sm:$0xff]  ;;  %v1826_v29 = vld [vmem:[#allocation7 + $0x80] sm:$0xff] }
  0x35   :  { %722 = vmatpush.bf16.msrb.mxu0 %v1785_v41  ;;  %673 = vmatmul.bf16.vlgmr.msra.gmra.mxu1 %v117_v43  ;;  %v114_v41 = vld [vmem:[#allocation2 + $0xf0] sm:$0xff]  ;;  %v115_v43 = vld [vmem:[#allocation2 + $0xf8] sm:$0xff]  ;;  %v1839_v3 = vld [vmem:[#allocation7 + $0xe8] sm:$0xff] }
  0x36   :  { %692 = vmatmul.bf16.vlgmr.msra.gmra.mxu2 %v118_v44  ;;  %741 = vmatpush.bf16.msrb.mxu1 %v1793_v46  ;;  %v128_v44 = vpack.c.bf16 %v112_v37, %v104_v36  ;;  %v1827_v25 = vld [vmem:[#allocation7 + $0x88] sm:$0xff]  ;;  %v1818_v30 = vld [vmem:[#allocation7 + $0x40] sm:$0xff] }
  0x37   :  { %760 = vmatpush.bf16.msrb.mxu2 %v1801_v40  ;;  %711 = vmatmul.bf16.vlgmr.msra.gmra.mxu3 %v119_v45  ;;  %v106_v40 = vld [vmem:[#allocation2 + $0xb0] sm:$0xff]  ;;  %v129_v45 = vpack.c.bf16 %v113_v39, %v105_v38  ;;  %v1819_v26 = vld [vmem:[#allocation7 + $0x48] sm:$0xff]  ;;  %v1834_v31 = vld [vmem:[#allocation7 + $0xc0] sm:$0xff] }
  0x38   :  { %779 = vmatpush.bf16.msrb.mxu3 %v1809_v47  ;;  %v130_v46 = vpack.c.bf16 %v114_v41, %v106_v40  ;;  %v131_v47 = vpack.c.bf16 %v115_v43, %v107_v42  ;;  %v1835_v27 = vld [vmem:[#allocation7 + $0xc8] sm:$0xff] }
  0x39   :  { %723 = vmatpush.bf16.msrb.mxu0 %v1784_v49  ;;  %v1816_v49 = vld [vmem:[#allocation7 + $0x30] sm:$0xff] }
  0x3a   :  { %742 = vmatpush.bf16.msrb.mxu1 %v1792_v50  ;;  %v1815_v50 = vld [vmem:[#allocation7 + $0x28] sm:$0xff] }
  0x3b   :  { %761 = vmatpush.bf16.msrb.mxu2 %v1800_v48  ;;  %v1817_v48 = vld [vmem:[#allocation7 + $0x38] sm:$0xff] }
  0x3c   :  { %780 = vmatpush.bf16.msrb.mxu3 %v1808_v51 }
  0x3d   :  { %724 = vmatpush.bf16.msrb.mxu0 %v1783_v53  ;;  %v1833_v53 = vld [vmem:[#allocation7 + $0xb8] sm:$0xff] }
  0x3e   :  { %743 = vmatpush.bf16.msrb.mxu1 %v1791_v54  ;;  %v1825_v54 = vld [vmem:[#allocation7 + $0x78] sm:$0xff] }
  0x3f   :  { %762 = vmatpush.bf16.msrb.mxu2 %v1799_v52 }
  0x40   :  { %781 = vmatpush.bf16.msrb.mxu3 %v1807_v55  ;;  %v1841_v55 = vld [vmem:[#allocation7 + $0xf8] sm:$0xff] }
  0x41   :  { %725 = vmatpush.bf16.msrb.mxu0 %v1782_v57  ;;  %v1832_v57 = vld [vmem:[#allocation7 + $0xb0] sm:$0xff] }
  0x42   :  { %744 = vmatpush.bf16.msrb.mxu1 %v1790_v58  ;;  %v1824_v58 = vld [vmem:[#allocation7 + $0x70] sm:$0xff] }
  0x43   :  { %763 = vmatpush.bf16.msrb.mxu2 %v1798_v56  ;;  %v1814_v56 = vld [vmem:[#allocation7 + $0x20] sm:$0xff] }
  0x44   :  { %782 = vmatpush.bf16.msrb.mxu3 %v1806_v59  ;;  %659 = vmatmul.bf16.gmra.mxu0 %v124_v6  ;;  %v1840_v59 = vld [vmem:[#allocation7 + $0xf0] sm:$0xff]  ;;  %v1822_v6 = vld [vmem:[#allocation7 + $0x60] sm:$0xff] }
  0x45   :  { %726 = vmatpush.bf16.msrb.mxu0 %v1781_v5  ;;  %678 = vmatmul.bf16.gmra.mxu1 %v125_v7  ;;  %v1830_v5 = vld [vmem:[#allocation7 + $0xa0] sm:$0xff] }
  0x46   :  { %697 = vmatmul.bf16.gmra.mxu2 %v126_v8  ;;  %745 = vmatpush.bf16.msrb.mxu1 %v1789_v10  ;;  %v1838_v7 = vld [vmem:[#allocation7 + $0xe0] sm:$0xff]  ;;  %v1811_v8 = vld [vmem:[#allocation7 + $0x8] sm:$0xff] }
  0x47   :  { %764 = vmatpush.bf16.msrb.mxu2 %v1797_v4  ;;  %716 = vmatmul.bf16.gmra.mxu3 %v127_v9  ;;  %v1812_v4 = vld [vmem:[#allocation7 + $0x10] sm:$0xff] }
  0x48   :  { %783 = vmatpush.bf16.msrb.mxu3 %v1805_v11 }
  0x49   :  { %727 = vmatpush.bf16.msrb.mxu0 %v1780_v13  ;;  %v1829_v13 = vld [vmem:[#allocation7 + $0x98] sm:$0xff] }
  0x4a   :  { %746 = vmatpush.bf16.msrb.mxu1 %v1788_v14  ;;  %v1821_v14 = vld [vmem:[#allocation7 + $0x58] sm:$0xff] }
  0x4b   :  { %765 = vmatpush.bf16.msrb.mxu2 %v1796_v12 }
  0x4c   :  { %784 = vmatpush.bf16.msrb.mxu3 %v1804_v15  ;;  %v1837_v15 = vld [vmem:[#allocation7 + $0xd8] sm:$0xff] }
  0x4d   :  { %728 = vmatpush.bf16.msrb.mxu0 %v1779_v17  ;;  %v1828_v17 = vld [vmem:[#allocation7 + $0x90] sm:$0xff] }
  0x4e   :  { %747 = vmatpush.bf16.msrb.mxu1 %v1787_v18  ;;  %v1820_v18 = vld [vmem:[#allocation7 + $0x50] sm:$0xff] }
  0x4f   :  { %766 = vmatpush.bf16.msrb.mxu2 %v1795_v16  ;;  %v1810_v16 = vld [vmem:[#allocation7] sm:$0xff] }
  0x50   :  { %785 = vmatpush.bf16.msrb.mxu3 %v1803_v19  ;;  %v1836_v19 = vld [vmem:[#allocation7 + $0xd0] sm:$0xff] }
  0x51   :  { %729 = vmatpush.bf16.msrb.mxu0 %v1778_v21 }
  0x52   :  { %748 = vmatpush.bf16.msrb.mxu1 %v1786_v22 }
  0x53   :  { %767 = vmatpush.bf16.msrb.mxu2 %v1794_v20  ;;  %v1852_v20 = vld [vmem:[%s2104_s4] ss:$0 sm:$0xff] }
  0x54   :  { %786 = vmatpush.bf16.msrb.mxu3 %v1802_v23  ;;  %730 = vmatmul.bf16.vlgmr.msrb.gmra.mxu0 %v120_v32 }
  0x55   :  { %749 = vmatmul.bf16.vlgmr.msrb.gmra.mxu1 %v121_v33  ;;  %1110 = vmatpush.bf16.msra.mxu0 %v1817_v48 }
  0x56   :  { %768 = vmatmul.bf16.vlgmr.msrb.gmra.mxu2 %v122_v34  ;;  %1129 = vmatpush.bf16.msra.mxu1 %v1825_v54 }
  0x57   :  { %787 = vmatmul.bf16.vlgmr.msrb.gmra.mxu3 %v123_v35  ;;  %1148 = vmatpush.bf16.msra.mxu2 %v1833_v53 }
  0x58   :  { %1167 = vmatpush.bf16.msra.mxu3 %v1841_v55 }
  0x59   :  { %1111 = vmatpush.bf16.msra.mxu0 %v1816_v49 }
  0x5a   :  { %1130 = vmatpush.bf16.msra.mxu1 %v1824_v58 }
  0x5b   :  { %1149 = vmatpush.bf16.msra.mxu2 %v1832_v57 }
  0x5c   :  { %1168 = vmatpush.bf16.msra.mxu3 %v1840_v59 }
  0x5d   :  { %1112 = vmatpush.bf16.msra.mxu0 %v1815_v50 }
  0x5e   :  { %1131 = vmatpush.bf16.msra.mxu1 %v1823_v2 }
  0x5f   :  { %1150 = vmatpush.bf16.msra.mxu2 %v1831_v1 }
  0x60   :  { %1169 = vmatpush.bf16.msra.mxu3 %v1839_v3 }
  0x61   :  { %1113 = vmatpush.bf16.msra.mxu0 %v1814_v56 }
  0x62   :  { %1132 = vmatpush.bf16.msra.mxu1 %v1822_v6 }
  0x63   :  { %1151 = vmatpush.bf16.msra.mxu2 %v1830_v5 }
  0x64   :  { %735 = vmatmul.bf16.gmra.mxu0 %v128_v44  ;;  %1170 = vmatpush.bf16.msra.mxu3 %v1838_v7 }
  0x65   :  { %754 = vmatmul.bf16.gmra.mxu1 %v129_v45  ;;  %1114 = vmatpush.bf16.msra.mxu0 %v1813_v60 }
  0x66   :  { %773 = vmatmul.bf16.gmra.mxu2 %v130_v46  ;;  %1133 = vmatpush.bf16.msra.mxu1 %v1821_v14 }
  0x67   :  { %792 = vmatmul.bf16.gmra.mxu3 %v131_v47  ;;  %1152 = vmatpush.bf16.msra.mxu2 %v1829_v13 }
  0x68   :  { %1171 = vmatpush.bf16.msra.mxu3 %v1837_v15 }
  0x69   :  { %1115 = vmatpush.bf16.msra.mxu0 %v1812_v4 }
  0x6a   :  { %1134 = vmatpush.bf16.msra.mxu1 %v1820_v18 }
  0x6b   :  { %1153 = vmatpush.bf16.msra.mxu2 %v1828_v17 }
  0x6c   :  { %1172 = vmatpush.bf16.msra.mxu3 %v1836_v19 }
  0x6d   :  { %1116 = vmatpush.bf16.msra.mxu0 %v1811_v8 }
  0x6e   :  { %1135 = vmatpush.bf16.msra.mxu1 %v1819_v26 }
  0x6f   :  { %1154 = vmatpush.bf16.msra.mxu2 %v1827_v25 }
  0x70   :  { %1173 = vmatpush.bf16.msra.mxu3 %v1835_v27 }
  0x71   :  { %1117 = vmatpush.bf16.msra.mxu0 %v1810_v16 }
  0x72   :  { %1136 = vmatpush.bf16.msra.mxu1 %v1818_v30 }
  0x73   :  { %1155 = vmatpush.bf16.msra.mxu2 %v1826_v29 }
  0x74   :  { %1174 = vmatpush.bf16.msra.mxu3 %v1834_v31 }
  0xb1   :  { %v2034_v51 = vpop.f32.mrf.mxu0 }
  0xb2   :  { %v2036_v52 = vpop.f32.mrf.mxu1  ;;  %v656_v28 = vadd.f32 %v1852_v20, %v2034_v51 }
  0xb4   :  { %v675_v32 = vadd.f32 %v2036_v52, %v656_v28 }
  0xb9   :  { %v2038_v61 = vpop.f32.mrf.mxu2  ;;  %v657_v63 = vpop.f32.mrf.mxu0 }
  0xba   :  { %v2040_v62 = vpop.f32.mrf.mxu3  ;;  %v676_v0 = vpop.f32.mrf.mxu1  ;;  %v658_v33 = vadd.f32 %v1852_v20, %v657_v63  ;;  %v694_v38 = vadd.f32 %v2038_v61, %v675_v32 }
  0xbc   :  { %v677_v39 = vadd.f32 %v676_v0, %v658_v33  ;;  %v713_v42 = vadd.f32 %v2040_v62, %v694_v38 }
  0xc1   :  { %v695_v9 = vpop.f32.mrf.mxu2  ;;  %v660_v11 = vpop.f32.mrf.mxu0 }
  0xc2   :  { %v714_v10 = vpop.f32.mrf.mxu3  ;;  %v679_v12 = vpop.f32.mrf.mxu1  ;;  %v696_v40 = vadd.f32 %v695_v9, %v677_v39  ;;  %v661_v41 = vadd.f32 %v1852_v20, %v660_v11 }
  0xc4   :  { %v715_v44 = vadd.f32 %v714_v10, %v696_v40  ;;  %v680_v45 = vadd.f32 %v679_v12, %v661_v41 }
  0xc9   :  { %v698_v21 = vpop.f32.mrf.mxu2  ;;  %v662_v23 = vpop.f32.mrf.mxu0 }
  0xca   :  { %v717_v22 = vpop.f32.mrf.mxu3  ;;  %v681_v24 = vpop.f32.mrf.mxu1  ;;  %v699_v51 = vadd.f32 %v698_v21, %v680_v45  ;;  %v663_v53 = vadd.f32 %v1852_v20, %v662_v23 }
  0xcc   :  { %v718_v57 = vadd.f32 %v717_v22, %v699_v51  ;;  %v682_v61 = vadd.f32 %v681_v24, %v663_v53  ;;  %v1320_v51 = vld [vmem:[#allocation8 + $0x70] sm:$0xff]  ;;  %v1190_v53 = vlaneseq }
  0xd1   :  { %v700_v34 = vpop.f32.mrf.mxu2  ;;  %v731_v36 = vpop.f32.mrf.mxu0 }
  0xd2   :  { %v719_v35 = vpop.f32.mrf.mxu3  ;;  %v750_v37 = vpop.f32.mrf.mxu1  ;;  %v732_v46 = vadd.f32 %v731_v36, %v713_v42  ;;  %v701_v2 = vadd.f32 %v700_v34, %v682_v61 }
  0xd4   :  { %v751_v52 = vadd.f32 %v750_v37, %v732_v46  ;;  %v720_v6 = vadd.f32 %v719_v35, %v701_v2  ;;  %v2061_v2 = vand.u32 127, %v1190_v53 }
  0xd6   :  { %vm1260_vm3 = vcmp.ge.s32.totalorder %v2061_v2, 8  ;;  %vm1261_vm4 = vcmp.lt.s32.totalorder %v2061_v2, 16  ;;  %vm1246_vm5 = vcmp.lt.s32.totalorder %v2061_v2, 8  ;;  %vm1275_vm9 = vcmp.ge.s32.totalorder %v2061_v2, 16 }
  0xd7   :  { %vm2069_vm7 = vmand %vm1260_vm3, %vm1261_vm4  ;;  %vm1276_vm10 = vcmp.lt.s32.totalorder %v2061_v2, 24 }
  0xd8   :  { %vm2083_vm13 = vmand %vm1275_vm9, %vm1276_vm10 }
  0xd9   :  { %v769_v43 = vpop.f32.mrf.mxu2  ;;  %v733_v48 = vpop.f32.mrf.mxu0 }
  0xda   :  { %v788_v47 = vpop.f32.mrf.mxu3  ;;  %v752_v49 = vpop.f32.mrf.mxu1  ;;  %v734_v50 = vadd.f32 %v733_v48, %v715_v44  ;;  %v770_v54 = vadd.f32 %v769_v43, %v751_v52  ;;  %v1319_v52 = vld [vmem:[#allocation8 + $0x68] sm:$0xff] }
  0xdc   :  { %v753_v55 = vadd.f32 %v752_v49, %v734_v50  ;;  %v789_v62 = vadd.f32 %v788_v47, %v770_v54  ;;  %v1321_v49 = vld [vmem:[#allocation8 + $0x78] sm:$0xff]  ;;  %v1318_v54 = vld [vmem:[#allocation8 + $0x60] sm:$0xff] }
  0xdd   :  { %1322 = vmatpush.msrb.mxu0 %v1321_v49 }
  0xde   :  { %v803_v15 = vrot.slane %v789_v62, 1  ;;  %v817_v16 = vrot.slane %v789_v62, 2  ;;  %v831_v17 = vrot.slane %v789_v62, 3 }
  0xdf   :  { %1323 = vmatpush.msrb.mxu0 %v1320_v51 }
  0xe1   :  { %v771_v56 = vpop.f32.mrf.mxu2  ;;  %v736_v60 = vpop.f32.mrf.mxu0  ;;  %1324 = vmatpush.msrb.mxu0 %v1319_v52 }
  0xe2   :  { %v772_v58 = vadd.f32 %v771_v56, %v753_v55  ;;  %v790_v59 = vpop.f32.mrf.mxu3  ;;  %v737_v0 = vadd.f32 %v736_v60, %v718_v57  ;;  %v755_v1 = vpop.f32.mrf.mxu1  ;;  %v1317_v56 = vld [vmem:[#allocation8 + $0x58] sm:$0xff]  ;;  %v1191_v57 = vshrl.u32 %v1190_v53, 7  ;;  %v1315_v60 = vld [vmem:[#allocation8 + $0x48] sm:$0xff] }
  0xe3   :  { %1325 = vmatpush.msrb.mxu0 %v1318_v54 }
  0xe4   :  { %v791_v63 = vadd.f32 %v790_v59, %v772_v58  ;;  %v756_v4 = vadd.f32 %v755_v1, %v737_v0  ;;  %v1316_v58 = vld [vmem:[#allocation8 + $0x50] sm:$0xff] }
  0xe5   :  { %1326 = vmatpush.msrb.mxu0 %v1317_v56 }
  0xe6   :  { %v844_v3 = vpack.c.bf16 %v791_v63, %v789_v62  ;;  %v804_v10 = vrot.slane %v791_v63, 1  ;;  %v818_v11 = vrot.slane %v791_v63, 2  ;;  %v832_v12 = vrot.slane %v791_v63, 3  ;;  %v1314_v63 = vld [vmem:[#allocation8 + $0x40] sm:$0xff] }
  0xe7   :  { %1327 = vmatpush.msrb.mxu0 %v1316_v58  ;;  %v1192_v62 = vadd.s32 8, %v1191_v57 }
  0xe8   :  { %1118 = vmatmul.bf16.vlgmr.msra.gmra.mxu0 %v844_v3  ;;  %v805_v22 = vsel %vm802_vm0, %v803_v15, %v804_v10  ;;  %v819_v23 = vsel %vm816_vm1, %v817_v16, %v818_v11  ;;  %v833_v24 = vsel %vm830_vm2, %v831_v17, %v832_v12  ;;  %v1313_v3 = vld [vmem:[#allocation8 + $0x38] sm:$0xff] }
  0xe9   :  { %v774_v5 = vpop.f32.mrf.mxu2  ;;  %v738_v9 = vpop.f32.mrf.mxu0  ;;  %1328 = vmatpush.msrb.mxu0 %v1315_v60 }
  0xea   :  { %v775_v7 = vadd.f32 %v774_v5, %v756_v4  ;;  %v793_v8 = vpop.f32.mrf.mxu3  ;;  %v739_v14 = vadd.f32 %v738_v9, %v720_v6  ;;  %v757_v21 = vpop.f32.mrf.mxu1  ;;  %v1853_v4 = vld [vmem:[%s2104_s4 + $0x1] ss:$0 sm:$0xff]  ;;  %v1206_v5 = vand.u32 15, %v1192_v62  ;;  %v1312_v6 = vld [vmem:[#allocation8 + $0x30] sm:$0xff]  ;;  %s1991_s4 = smov [#allocation10]  }
  0xeb   :  { %1329 = vmatpush.msrb.mxu0 %v1314_v63  ;;  %s1348_s18 = sshll.u32 %s1991_s4, 4  ;;  %s1349_s18 = int_to_ptr.vmem [resolvable:$true] %s1348_s18 }
  0xec   :  { %v794_v13 = vadd.f32 %v793_v8, %v775_v7  ;;  %v758_v25 = vadd.f32 %v757_v21, %v739_v14  ;;  %v1311_v8 = vld [vmem:[#allocation8 + $0x28] sm:$0xff]  ;;  %vm1249_vm6 = vcmp.gt.s32.totalorder %v1206_v5, 14  ;;  %v1309_v14 = vld [vmem:[#allocation8 + $0x18] sm:$0xff]  ;;  %vm1264_vm8 = vcmp.gt.s32.totalorder %v1206_v5, 13 }
  0xed   :  { %1330 = vmatpush.msrb.mxu0 %v1313_v3  ;;  %vm1253_vm11 = vmand %vm1246_vm5, %vm1249_vm6  ;;  %vm1279_vm14 = vcmp.gt.s32.totalorder %v1206_v5, 12 }
  0xee   :  { %v806_v18 = vrot.slane %v794_v13, 1  ;;  %v820_v19 = vrot.slane %v794_v13, 2  ;;  %v834_v20 = vrot.slane %v794_v13, 3  ;;  %vm2079_vm12 = vmand %vm2069_vm7, %vm1264_vm8 }
  0xef   :  { %1331 = vmatpush.msrb.mxu0 %v1312_v6  ;;  %vm1283_vm15 = vmand %vm2083_vm13, %vm1279_vm14 }
  0xf0   :  { %v807_v26 = vsel %vm802_vm0, %v804_v10, %v806_v18  ;;  %v821_v27 = vsel %vm816_vm1, %v818_v11, %v820_v19  ;;  %v835_v28 = vsel %vm830_vm2, %v832_v12, %v834_v20 }
  0xf1   :  { %v776_v29 = vpop.f32.mrf.mxu2  ;;  %v845_v30 = vpack.c.bf16 %v807_v26, %v805_v22  ;;  %v846_v31 = vpack.c.bf16 %v821_v27, %v819_v23  ;;  %v847_v32 = vpack.c.bf16 %v835_v28, %v833_v24  ;;  %1332 = vmatpush.msrb.mxu0 %v1311_v8  ;;  %v1307_v24 = vld [vmem:[#allocation8 + $0x8] sm:$0xff]  ;;  %v1306_v27 = vld [vmem:[#allocation8] sm:$0xff] }
  0xf2   :  { %v777_v33 = vadd.f32 %v776_v29, %v758_v25  ;;  %v795_v34 = vpop.f32.mrf.mxu3 }
  0xf3   :  { %1137 = vmatmul.bf16.vlgmr.msra.gmra.mxu1 %v845_v30  ;;  %1156 = vmatmul.bf16.vlgmr.msra.gmra.mxu2 %v846_v31 }
  0xf4   :  { %v796_v35 = vadd.f32 %v795_v34, %v777_v33  ;;  %1175 = vmatmul.bf16.vlgmr.msra.gmra.mxu3 %v847_v32  ;;  %v1194_v33 = vadd.s32 24, %v1191_v57 }
  0xf6   :  { %v848_v36 = vpack.c.bf16 %v796_v35, %v794_v13  ;;  %v808_v37 = vrot.slane %v796_v35, 1  ;;  %v822_v38 = vrot.slane %v796_v35, 2  ;;  %v836_v39 = vrot.slane %v796_v35, 3  ;;  %v1310_v13 = vld [vmem:[#allocation8 + $0x20] sm:$0xff] }
  0xf7   :  { %1333 = vmatpush.msrb.mxu0 %v1310_v13 }
  0xf8   :  { %1123 = vmatmul.bf16.gmra.mxu0 %v848_v36  ;;  %v809_v40 = vsel %vm802_vm0, %v806_v18, %v808_v37  ;;  %v815_v41 = vsel %vm802_vm0, %v808_v37, %v803_v15  ;;  %v823_v42 = vsel %vm816_vm1, %v820_v19, %v822_v38  ;;  %v829_v43 = vsel %vm816_vm1, %v822_v38, %v817_v16 }
  0xf9   :  { %v837_v44 = vsel %vm830_vm2, %v834_v20, %v836_v39  ;;  %v843_v45 = vsel %vm830_vm2, %v836_v39, %v831_v17  ;;  %v849_v46 = vpack.c.bf16 %v815_v41, %v809_v40  ;;  %v850_v47 = vpack.c.bf16 %v829_v43, %v823_v42  ;;  %v1308_v20 = vld [vmem:[#allocation8 + $0x10] sm:$0xff]  ;;  %1334 = vmatpush.msrb.mxu0 %v1309_v14 }
  0xfa   :  { %v851_v48 = vpack.c.bf16 %v843_v45, %v837_v44  ;;  %v1220_v40 = vand.u32 15, %v1194_v33 }
  0xfb   :  { %1335 = vmatpush.msrb.mxu0 %v1308_v20 }
  0xfc   :  { %vm1251_vm0 = vcmp.gt.s32.totalorder %v1220_v40, 14  ;;  %vm1266_vm1 = vcmp.gt.s32.totalorder %v1220_v40, 13  ;;  %vm1281_vm2 = vcmp.gt.s32.totalorder %v1220_v40, 12 }
  0xfd   :  { %1336 = vmatpush.msrb.mxu0 %v1307_v24  ;;  %vm1255_vm3 = vmand %vm1246_vm5, %vm1251_vm0  ;;  %vm1304_vm5 = vcmask 1040384  }
  0xfe   :  { %vm1270_vm4 = vmand %vm2069_vm7, %vm1266_vm1 }
  0xff   :  { %1337 = vmatpush.msrb.mxu0 %v1306_v27  ;;  %vm1285_vm6 = vmand %vm2083_vm13, %vm1281_vm2 }
 0x103   :  { %1142 = vmatmul.bf16.gmra.mxu1 %v849_v46  ;;  %1161 = vmatmul.bf16.gmra.mxu2 %v850_v47 }
 0x104   :  { %1180 = vmatmul.bf16.gmra.mxu3 %v851_v48 }
 0x165   :  { %v1119_v50 = vpop.f32.mrf.mxu0 }
 0x166   :  { %v1120_v10 = vadd.f32 %v1853_v4, %v1119_v50 }
 0x16d   :  { %v1121_v59 = vpop.f32.mrf.mxu0 }
 0x16e   :  { %v1122_v7 = vadd.f32 %v1853_v4, %v1121_v59 }
 0x170   :  { %v1138_v55 = vpop.f32.mrf.mxu1 }
 0x171   :  { %v1139_v18 = vadd.f32 %v1138_v55, %v1120_v10 }
 0x175   :  { %v1124_v11 = vpop.f32.mrf.mxu0 }
 0x176   :  { %v1157_v61 = vpop.f32.mrf.mxu2  ;;  %v1125_v36 = vadd.f32 %v1853_v4, %v1124_v11 }
 0x177   :  { %v1176_v0 = vpop.f32.mrf.mxu3  ;;  %v1158_v22 = vadd.f32 %v1157_v61, %v1139_v18 }
 0x178   :  { %v1140_v1 = vpop.f32.mrf.mxu1 }
 0x179   :  { %v1141_v9 = vadd.f32 %v1140_v1, %v1122_v7  ;;  %v1177_v29 = vadd.f32 %v1176_v0, %v1158_v22 }
 0x17b   :  { %v1186_v37 = vmax.f32 %v1177_v29, 0.0 }
 0x17d   :  { %v1126_v34 = vpop.f32.mrf.mxu0 }
 0x17e   :  { %v1159_v12 = vpop.f32.mrf.mxu2  ;;  %v1127_v39 = vadd.f32 %v1853_v4, %v1126_v34 }
 0x17f   :  { %v1160_v15 = vadd.f32 %v1159_v12, %v1141_v9  ;;  %v1178_v16 = vpop.f32.mrf.mxu3 }
 0x180   :  { %v1143_v19 = vpop.f32.mrf.mxu1 }
 0x181   :  { %v1179_v21 = vadd.f32 %v1178_v16, %v1160_v15  ;;  %v1144_v42 = vadd.f32 %v1143_v19, %v1125_v36 }
 0x183   :  { %v1187_v25 = vmax.f32 %v1179_v21, 0.0 }
 0x185   :  { %v1257_v28 = vsel %vm1253_vm11, -1e+30, %v1187_v25 }
 0x186   :  { %v1272_v30 = vsel %vm2079_vm12, -1e+30, %v1257_v28  ;;  %v1162_v31 = vpop.f32.mrf.mxu2 }
 0x187   :  { %v1181_v32 = vpop.f32.mrf.mxu3  ;;  %v1287_v35 = vsel %vm1283_vm15, -1e+30, %v1272_v30  ;;  %v1163_v44 = vadd.f32 %v1162_v31, %v1144_v42 }
 0x188   :  { %v1145_v38 = vpop.f32.mrf.mxu1  ;;  %v1290_v41 = vmax.f32 %v1186_v37, %v1287_v35 }
 0x189   :  { %v1146_v43 = vadd.f32 %v1145_v38, %v1127_v39  ;;  %v1182_v50 = vadd.f32 %v1181_v32, %v1163_v44 }
 0x18a   :  { %v1291_v47 = vrot.slane %v1290_v41, 4 }
 0x18b   :  { %v1188_v54 = vmax.f32 %v1182_v50, 0.0 }
 0x18c   :  { %v1292_v52 = vmax.f32 %v1290_v41, %v1291_v47 }
 0x18e   :  { %v1164_v45 = vpop.f32.mrf.mxu2  ;;  %v1293_v57 = vrot.slane %v1292_v52, 2 }
 0x18f   :  { %v1165_v46 = vadd.f32 %v1164_v45, %v1146_v43  ;;  %v1183_v48 = vpop.f32.mrf.mxu3 }
 0x190   :  { %v1294_v61 = vmax.f32 %v1292_v52, %v1293_v57 }
 0x191   :  { %v1184_v49 = vadd.f32 %v1183_v48, %v1165_v46 }
 0x192   :  { %v1295_v63 = vrot.slane %v1294_v61, 1 }
 0x193   :  { %v1189_v51 = vmax.f32 %v1184_v49, 0.0 }
 0x194   :  { %v1296_v2 = vmax.f32 %v1294_v61, %v1295_v63 }
 0x195   :  { %v1259_v53 = vsel %vm1255_vm3, -1e+30, %v1189_v51 }
 0x196   :  { %v1274_v55 = vsel %vm1270_vm4, -1e+30, %v1259_v53 }
 0x197   :  { %v1289_v56 = vsel %vm1285_vm6, -1e+30, %v1274_v55 }
 0x198   :  { %v1297_v58 = vmax.f32 %v1188_v54, %v1289_v56 }
 0x19a   :  { %v1298_v59 = vrot.slane %v1297_v58, 4 }
 0x19c   :  { %v1299_v60 = vmax.f32 %v1297_v58, %v1298_v59 }
 0x19e   :  { %v1300_v62 = vrot.slane %v1299_v60, 2 }
 0x1a0   :  { %v1301_v0 = vmax.f32 %v1299_v60, %v1300_v62 }
 0x1a2   :  { %v1302_v1 = vrot.slane %v1301_v0, 1 }
 0x1a4   :  { %v1303_v3 = vmax.f32 %v1301_v0, %v1302_v1 }
 0x1a6   :  { %v1305_v4 = vsel %vm1304_vm5, %v1296_v2, %v1303_v3 }
 0x1a7   :  { %1338 = vmatmul.f32.vlgmr.msrb.gmra.mxu0 %v1305_v4 }
 0x224   :  { %v1339_v5 = vpop.f32.mrf.mxu0 }
 0x225   :  { %1342 = vst [vmem:[#allocation10] sm:$0x3] %v1339_v5 }
 0x226   :  { %1353 = dma.vmem_to_hbm [thread:$0]  %s1349_s18, 32, %s1351_s21, [#allocation4]  }
 0x227   :  { %1980 = dma.done.wait [#allocation4], 32  }
 0x228   :  { %1981 = vsyncadd [#allocation4], 4294967264 }
 0x229   :  { %1358 = vsyncpa [#allocation3], 1 }
 0x22a   :  { %1359 = vsyncpa [#allocation6], 1 }
 0x22b   :  { %1360 = vsyncpa [#allocation9], 1 }
 0x22c   :  { %1361 = vsyncpa [#allocation4], 1 }

</bundles_post_ra>
